<compile_context>
chip_gen: v7x
topology: tpu7x:2x2x1
jax: 0.10.0
libtpu: 0.0.40
codegen_flags: <defaults>
</compile_context>

<pallas_src>
import functools
import math

import jax
import jax.numpy as jnp
from jax.experimental import pallas as pl
from jax.experimental.pallas import tpu as pltpu

_LANE = 128


def _round_up(x, m):
    return (x + m - 1) // m * m


def _pad_axis(x, axis, target):
    pad = target - x.shape[axis]
    if pad <= 0:
        return x
    widths = [(0, 0)] * x.ndim
    widths[axis] = (0, pad)
    return jnp.pad(x, widths)


def _metanet_kernel(hx_ref, y_ref,
                    w1h_ref, embw1_ref, b1_ref,
                    w2_ref, b2_ref,
                    w3c_ref, b3c_ref, w3a_ref, b3a_ref,
                    out_ref, alpha_ref,
                    *, num_classes, skip):
    """One (TILE_B, ...) batch tile: fused embed+concat, 3-layer MLP, blend."""
    hx = hx_ref[...]                                   # (tb, hx_dim) f32
    y = y_ref[...]                                     # (tb, 1) int32
    tb = hx.shape[0]

    # one-hot(y): used both as the embedding selector and in the final blend.
    cls_ids = jax.lax.broadcasted_iota(jnp.int32, (tb, num_classes), 1)
    onehot = (cls_ids == y).astype(jnp.float32)        # (tb, C) f32
    onehot_bf = onehot.astype(jnp.bfloat16)

    # Layer 1: hin @ W1 == hx @ W1[:hx_dim] + onehot @ (cls_emb @ W1[hx_dim:])
    z1 = (jnp.dot(hx.astype(jnp.bfloat16), w1h_ref[...],
                  preferred_element_type=jnp.float32)
          + jnp.dot(onehot_bf, embw1_ref[...],
                    preferred_element_type=jnp.float32)
          + b1_ref[...])
    h1 = jnp.tanh(z1)                                  # f32, lane-padded hidden

    h2 = jnp.tanh(jnp.dot(h1.astype(jnp.bfloat16), w2_ref[...],
                          preferred_element_type=jnp.float32) + b2_ref[...])
    h2_bf = h2.astype(jnp.bfloat16)

    # Class head -> softmax (elementwise math kept in f32).
    logit = jnp.dot(h2_bf, w3c_ref[...],
                    preferred_element_type=jnp.float32) + b3c_ref[...]
    m = jnp.max(logit, axis=-1, keepdims=True)
    e = jnp.exp(logit - m)
    sm = e / jnp.sum(e, axis=-1, keepdims=True)

    if skip:
        a_logit = jnp.dot(h2_bf, w3a_ref[...],
                          preferred_element_type=jnp.float32) + b3a_ref[...]
        alpha = jax.nn.sigmoid(a_logit)                # (tb, skip) f32
        out = alpha * onehot + (1.0 - alpha) * sm
        alpha_ref[...] = alpha
    else:
        out = sm
        alpha_ref[...] = jnp.zeros_like(alpha_ref)

    out_ref[...] = out.astype(out_ref.dtype)


def _prepare_weights(params, *, hx_dim, num_classes, skip, h_pad):
    """Split / fold / pad / cast f32 params into kernel-ready operands."""
    cls_emb = params["cls_emb"].astype(jnp.float32)    # (C, cls_dim)
    w1, b1 = params["w1"], params["b1"]                # (in_dim, h), (1, h)
    w2, b2 = params["w2"], params["b2"]                # (h, h),      (1, h)
    w3, b3 = params["w3"], params["b3"]                # (h, C+skip), (1, C+skip)

    # Fuse embedding+concat into layer 1.
    w1h = w1[:hx_dim]                                  # (hx_dim, h)
    embw1 = cls_emb @ w1[hx_dim:]                      # (C, h) per-class table

    # Split the output head so the kernel never lane-slices the logits.
    w3c, b3c = w3[:, :num_classes], b3[:, :num_classes]
    if skip:
        w3a, b3a = w3[:, num_classes:], b3[:, num_classes:]
    else:                                              # static dummies
        w3a = jnp.zeros((w3.shape[0], 1), jnp.float32)
        b3a = jnp.zeros((1, 1), jnp.float32)

    # Zero-pad hidden dim to the 128-lane width: padded lanes stay exactly zero
    # through tanh and hit zero rows of the next layer's weights.
    w1h = _pad_axis(w1h, 1, h_pad)
    embw1 = _pad_axis(embw1, 1, h_pad)
    b1 = _pad_axis(b1, 1, h_pad)
    w2 = _pad_axis(_pad_axis(w2, 0, h_pad), 1, h_pad)
    b2 = _pad_axis(b2, 1, h_pad)
    w3c = _pad_axis(w3c, 0, h_pad)
    w3a = _pad_axis(w3a, 0, h_pad)

    bf = lambda a: a.astype(jnp.bfloat16)
    f32 = lambda a: a.astype(jnp.float32)
    return (bf(w1h), bf(embw1), f32(b1), bf(w2), f32(b2),
            bf(w3c), f32(b3c), bf(w3a), f32(b3a))


def metanet_forward(hx, y, params, *, num_classes, skip, tile_b=None):
    """hx: (bs, hx_dim) f32, y: (bs,) int. Returns (out (bs, C) f32, alpha_mean)."""
    bs, hx_dim = hx.shape
    h_dim = params["w1"].shape[1]
    h_pad = _round_up(h_dim, _LANE)

    weights = _prepare_weights(params, hx_dim=hx_dim, num_classes=num_classes,
                               skip=skip, h_pad=h_pad)
    a_dim = weights[7].shape[1]                        # skip (or 1 dummy lane)

    if tile_b is None:
        # Large tiles amortize the ~0.35 us/step overhead; cap keeps VMEM modest.
        tile_b = min(1024, _round_up(bs, 8))
    bs_pad = _round_up(bs, tile_b)
    num_tiles = bs_pad // tile_b

    hx_p = jnp.pad(hx.astype(jnp.float32), ((0, bs_pad - bs), (0, 0)))
    y_p = jnp.pad(y.astype(jnp.int32).reshape(-1, 1), ((0, bs_pad - bs), (0, 0)))

    kernel = functools.partial(_metanet_kernel,
                               num_classes=num_classes, skip=skip)

    def batch_spec(feat):                              # streamed per grid step
        return pl.BlockSpec((tile_b, feat), lambda i: (i, 0))

    def resident_spec(shape):                          # same block every step
        return pl.BlockSpec(shape, lambda i: (0, 0))

    out, alpha = pl.pallas_call(
        kernel,
        grid=(num_tiles,),
        out_shape=(jax.ShapeDtypeStruct((bs_pad, num_classes), jnp.float32),
                   jax.ShapeDtypeStruct((bs_pad, a_dim), jnp.float32)),
        in_specs=[batch_spec(hx_dim), batch_spec(1)]
                 + [resident_spec(w.shape) for w in weights],
        out_specs=(batch_spec(num_classes), batch_spec(a_dim)),
        compiler_params=pltpu.CompilerParams(
            dimension_semantics=("parallel",),         # shard across v7x's 2 TCs
            vmem_limit_bytes=32 * 1024 * 1024),
    )(hx_p, y_p, *weights)

    out = out[:bs]
    if skip:
        alpha_mean = jnp.mean(alpha[:bs])              # padded rows excluded
    else:
        alpha_mean = jnp.zeros((), jnp.float32)
    return out, alpha_mean


def init_metanet_params(key, *, hx_dim, cls_dim, h_dim, num_classes, skip):
    """Deterministic init mirroring MetaNet.init_weights (tie=False), f32."""
    in_dim = hx_dim + cls_dim
    out_dim = num_classes + skip
    k_emb, k1, k2, k3 = jax.random.split(key, 4)

    # Embedding (num_classes, cls_dim) — xavier_uniform_
    lim = math.sqrt(6.0 / (num_classes + cls_dim))
    cls_emb = jax.random.uniform(k_emb, (num_classes, cls_dim),
                                 jnp.float32, -lim, lim)

    def xavier_normal(k, fan_out, fan_in):
        std = math.sqrt(2.0 / (fan_in + fan_out))
        # PyTorch weight is (out, in); store transposed (in, out) for x @ W.
        return (jax.random.normal(k, (fan_out, fan_in), jnp.float32) * std).T

    w1 = xavier_normal(k1, h_dim, in_dim)              # (in_dim, h_dim)
    w2 = xavier_normal(k2, h_dim, h_dim)               # (h_dim, h_dim)
    w3 = xavier_normal(k3, out_dim, h_dim)             # (h_dim, out_dim)
    b1 = jnp.zeros((1, h_dim), jnp.float32)
    b2 = jnp.zeros((1, h_dim), jnp.float32)
    b3 = jnp.zeros((1, out_dim), jnp.float32)          # bias exists since tie=False

    return dict(cls_emb=cls_emb, w1=w1, b1=b1, w2=w2, b2=b2, w3=w3, b3=b3)


def _reference_forward(hx, y, params, *, num_classes, skip):
    """Pure-JAX f32 reference (mirrors the PyTorch module)."""
    y_emb = jnp.take(params["cls_emb"], y, axis=0)
    hin = jnp.concatenate([hx, y_emb], axis=-1)
    h1 = jnp.tanh(hin @ params["w1"] + params["b1"])
    h2 = jnp.tanh(h1 @ params["w2"] + params["b2"])
    logit = h2 @ params["w3"] + params["b3"]
    if skip:
        alpha = jax.nn.sigmoid(logit[:, num_classes:])
        cls_logit = logit[:, :num_classes]
    else:
        alpha = None
        cls_logit = logit
    sm = jax.nn.softmax(cls_logit, axis=-1)
    if skip:
        onehot = jax.nn.one_hot(y, num_classes, dtype=jnp.float32)
        out = alpha * onehot + (1.0 - alpha) * sm
        return out, jnp.mean(alpha)
    return sm, jnp.zeros((), jnp.float32)


if __name__ == "__main__":
    # args: skip=1, tie=False, sparsemax=False
    HX_DIM, CLS_DIM, H_DIM, NUM_CLASSES, SKIP = 24, 8, 32, 6, 1
    BS = 8

    root = jax.random.PRNGKey(0)
    k_param, k_hx, k_y = jax.random.split(root, 3)

    params = init_metanet_params(k_param, hx_dim=HX_DIM, cls_dim=CLS_DIM,
                                 h_dim=H_DIM, num_classes=NUM_CLASSES,
                                 skip=SKIP)
    hx = jax.random.normal(k_hx, (BS, HX_DIM), jnp.float32)
    y = jax.random.randint(k_y, (BS,), 0, NUM_CLASSES, jnp.int32)

    out, alpha_mean = metanet_forward(hx, y, params,
                                      num_classes=NUM_CLASSES, skip=SKIP)
    jax.block_until_ready((out, alpha_mean))

    # Sanity 1: rows are convex combos of softmax & one-hot -> sum to 1.
    assert out.shape == (BS, NUM_CLASSES)
    row_sums = jnp.sum(out, axis=-1)
    assert bool(jnp.all(jnp.abs(row_sums - 1.0) < 1e-5))

    # Sanity 2: matches the pure-JAX f32 reference (loose tol for bf16 MXU ops).
    ref_out, ref_alpha = _reference_forward(hx, y, params,
                                            num_classes=NUM_CLASSES, skip=SKIP)
    assert bool(jnp.max(jnp.abs(out - ref_out)) < 5e-2)
    assert bool(jnp.abs(alpha_mean - ref_alpha) < 5e-2)

    print("KERNEL_OK")
</pallas_src>

<mosaic_0001>
module attributes {stable_mosaic.version = 11 : i64} {
  func.func @_metanet_kernel(%arg0: i32, %arg1: memref<8x24xf32, #tpu.memory_space<vmem>>, %arg2: memref<8x1xi32, #tpu.memory_space<vmem>>, %arg3: memref<24x128xbf16, #tpu.memory_space<vmem>>, %arg4: memref<6x128xbf16, #tpu.memory_space<vmem>>, %arg5: memref<1x128xf32, #tpu.memory_space<vmem>>, %arg6: memref<128x128xbf16, #tpu.memory_space<vmem>>, %arg7: memref<1x128xf32, #tpu.memory_space<vmem>>, %arg8: memref<128x6xbf16, #tpu.memory_space<vmem>>, %arg9: memref<1x6xf32, #tpu.memory_space<vmem>>, %arg10: memref<128x1xbf16, #tpu.memory_space<vmem>>, %arg11: memref<1x1xf32, #tpu.memory_space<vmem>>, %arg12: memref<8x6xf32, #tpu.memory_space<vmem>>, %arg13: memref<8x1xf32, #tpu.memory_space<vmem>>) attributes {dimension_semantics = [#tpu.dimension_semantics<parallel>], iteration_bounds = array<i64: 1>, scalar_prefetch = 0 : i64, scratch_operands = 0 : i64, tpu.core_type = #tpu.core_type<tc>, window_params = [{transform_indices = @transform_0, window_bounds = array<i64: 8, 24>}, {transform_indices = @transform_1, window_bounds = array<i64: 8, 1>}, {pipeline_mode = #tpu.pipeline_mode<synchronous>, transform_indices = @transform_2, window_bounds = array<i64: 24, 128>}, {pipeline_mode = #tpu.pipeline_mode<synchronous>, transform_indices = @transform_3, window_bounds = array<i64: 6, 128>}, {pipeline_mode = #tpu.pipeline_mode<synchronous>, transform_indices = @transform_4, window_bounds = array<i64: 1, 128>}, {pipeline_mode = #tpu.pipeline_mode<synchronous>, transform_indices = @transform_5, window_bounds = array<i64: 128, 128>}, {pipeline_mode = #tpu.pipeline_mode<synchronous>, transform_indices = @transform_6, window_bounds = array<i64: 1, 128>}, {pipeline_mode = #tpu.pipeline_mode<synchronous>, transform_indices = @transform_7, window_bounds = array<i64: 128, 6>}, {pipeline_mode = #tpu.pipeline_mode<synchronous>, transform_indices = @transform_8, window_bounds = array<i64: 1, 6>}, {pipeline_mode = #tpu.pipeline_mode<synchronous>, transform_indices = @transform_9, window_bounds = array<i64: 128, 1>}, {pipeline_mode = #tpu.pipeline_mode<synchronous>, transform_indices = @transform_10, window_bounds = array<i64: 1, 1>}, {transform_indices = @transform_11, window_bounds = array<i64: 8, 6>}, {transform_indices = @transform_12, window_bounds = array<i64: 8, 1>}]} {
    %c0 = arith.constant 0 : index
    %c0_0 = arith.constant 0 : index
    %0 = vector.load %arg1[%c0, %c0_0] : memref<8x24xf32, #tpu.memory_space<vmem>>, vector<8x24xf32>
    %c0_1 = arith.constant 0 : index
    %c0_2 = arith.constant 0 : index
    %1 = vector.load %arg2[%c0_1, %c0_2] : memref<8x1xi32, #tpu.memory_space<vmem>>, vector<8x1xi32>
    %2 = tpu.iota {dimensions = array<i32: 1>} : vector<8x6xi32>
    %3 = vector.broadcast %1 : vector<8x1xi32> to vector<8x6xi32>
    %4 = arith.cmpi eq, %2, %3 : vector<8x6xi32>
    %5 = arith.extui %4 : vector<8x6xi1> to vector<8x6xi32>
    %6 = arith.sitofp %5 : vector<8x6xi32> to vector<8x6xf32>
    %7 = arith.truncf %6 : vector<8x6xf32> to vector<8x6xbf16>
    %8 = arith.truncf %0 : vector<8x24xf32> to vector<8x24xbf16>
    %c0_3 = arith.constant 0 : index
    %c0_4 = arith.constant 0 : index
    %9 = vector.load %arg3[%c0_3, %c0_4] : memref<24x128xbf16, #tpu.memory_space<vmem>>, vector<24x128xbf16>
    %cst = arith.constant dense<0.000000e+00> : vector<8x128xf32>
    %10 = tpu.matmul %8, %9, %cst {dimension_numbers = #tpu.dot_dimension_numbers<[1], [0], [0], [1], [0, 0, 1, 1], [], []>} : vector<8x24xbf16>, vector<24x128xbf16>, vector<8x128xf32> -> vector<8x128xf32>
    %c0_5 = arith.constant 0 : index
    %c0_6 = arith.constant 0 : index
    %11 = vector.load %arg4[%c0_5, %c0_6] : memref<6x128xbf16, #tpu.memory_space<vmem>>, vector<6x128xbf16>
    %cst_7 = arith.constant dense<0.000000e+00> : vector<8x128xf32>
    %12 = tpu.matmul %7, %11, %cst_7 {dimension_numbers = #tpu.dot_dimension_numbers<[1], [0], [0], [1], [0, 0, 1, 1], [], []>} : vector<8x6xbf16>, vector<6x128xbf16>, vector<8x128xf32> -> vector<8x128xf32>
    %13 = arith.addf %10, %12 : vector<8x128xf32>
    %c0_8 = arith.constant 0 : index
    %c0_9 = arith.constant 0 : index
    %14 = vector.load %arg5[%c0_8, %c0_9] : memref<1x128xf32, #tpu.memory_space<vmem>>, vector<1x128xf32>
    %15 = vector.broadcast %14 : vector<1x128xf32> to vector<8x128xf32>
    %16 = arith.addf %13, %15 : vector<8x128xf32>
    %17 = math.tanh %16 : vector<8x128xf32>
    %18 = arith.truncf %17 : vector<8x128xf32> to vector<8x128xbf16>
    %c0_10 = arith.constant 0 : index
    %c0_11 = arith.constant 0 : index
    %19 = vector.load %arg6[%c0_10, %c0_11] : memref<128x128xbf16, #tpu.memory_space<vmem>>, vector<128x128xbf16>
    %cst_12 = arith.constant dense<0.000000e+00> : vector<8x128xf32>
    %20 = tpu.matmul %18, %19, %cst_12 {dimension_numbers = #tpu.dot_dimension_numbers<[1], [0], [0], [1], [0, 0, 1, 1], [], []>} : vector<8x128xbf16>, vector<128x128xbf16>, vector<8x128xf32> -> vector<8x128xf32>
    %c0_13 = arith.constant 0 : index
    %c0_14 = arith.constant 0 : index
    %21 = vector.load %arg7[%c0_13, %c0_14] : memref<1x128xf32, #tpu.memory_space<vmem>>, vector<1x128xf32>
    %22 = vector.broadcast %21 : vector<1x128xf32> to vector<8x128xf32>
    %23 = arith.addf %20, %22 : vector<8x128xf32>
    %24 = math.tanh %23 : vector<8x128xf32>
    %25 = arith.truncf %24 : vector<8x128xf32> to vector<8x128xbf16>
    %c0_15 = arith.constant 0 : index
    %c0_16 = arith.constant 0 : index
    %26 = vector.load %arg8[%c0_15, %c0_16] : memref<128x6xbf16, #tpu.memory_space<vmem>>, vector<128x6xbf16>
    %cst_17 = arith.constant dense<0.000000e+00> : vector<8x6xf32>
    %27 = tpu.matmul %25, %26, %cst_17 {dimension_numbers = #tpu.dot_dimension_numbers<[1], [0], [0], [1], [0, 0, 1, 1], [], []>} : vector<8x128xbf16>, vector<128x6xbf16>, vector<8x6xf32> -> vector<8x6xf32>
    %c0_18 = arith.constant 0 : index
    %c0_19 = arith.constant 0 : index
    %28 = vector.load %arg9[%c0_18, %c0_19] : memref<1x6xf32, #tpu.memory_space<vmem>>, vector<1x6xf32>
    %29 = vector.broadcast %28 : vector<1x6xf32> to vector<8x6xf32>
    %30 = arith.addf %27, %29 : vector<8x6xf32>
    %cst_20 = arith.constant dense<0xFF800000> : vector<8xf32>
    %31 = vector.multi_reduction <maximumf>, %30, %cst_20 [1] : vector<8x6xf32> to vector<8xf32>
    %32 = vector.shape_cast %31 : vector<8xf32> to vector<8x1xf32>
    %33 = vector.broadcast %32 : vector<8x1xf32> to vector<8x6xf32>
    %34 = arith.subf %30, %33 : vector<8x6xf32>
    %35 = math.exp %34 : vector<8x6xf32>
    %cst_21 = arith.constant dense<0.000000e+00> : vector<8xf32>
    %36 = vector.multi_reduction <add>, %35, %cst_21 [1] : vector<8x6xf32> to vector<8xf32>
    %37 = vector.shape_cast %36 : vector<8xf32> to vector<8x1xf32>
    %38 = vector.broadcast %37 : vector<8x1xf32> to vector<8x6xf32>
    %39 = arith.divf %35, %38 : vector<8x6xf32>
    %c0_22 = arith.constant 0 : index
    %c0_23 = arith.constant 0 : index
    %40 = vector.load %arg10[%c0_22, %c0_23] : memref<128x1xbf16, #tpu.memory_space<vmem>>, vector<128x1xbf16>
    %cst_24 = arith.constant dense<0.000000e+00> : vector<8x1xf32>
    %41 = tpu.matmul %25, %40, %cst_24 {dimension_numbers = #tpu.dot_dimension_numbers<[1], [0], [0], [1], [0, 0, 1, 1], [], []>} : vector<8x128xbf16>, vector<128x1xbf16>, vector<8x1xf32> -> vector<8x1xf32>
    %c0_25 = arith.constant 0 : index
    %c0_26 = arith.constant 0 : index
    %42 = vector.load %arg11[%c0_25, %c0_26] : memref<1x1xf32, #tpu.memory_space<vmem>>, vector<1x1xf32>
    %43 = vector.broadcast %42 : vector<1x1xf32> to vector<8x1xf32>
    %44 = arith.addf %41, %43 : vector<8x1xf32>
    %45 = arith.negf %44 : vector<8x1xf32>
    %46 = math.exp %45 : vector<8x1xf32>
    %cst_27 = arith.constant 1.000000e+00 : f32
    %47 = vector.broadcast %cst_27 : f32 to vector<8x1xf32>
    %48 = arith.addf %47, %46 : vector<8x1xf32>
    %49 = arith.divf %47, %48 : vector<8x1xf32>
    %50 = vector.broadcast %49 : vector<8x1xf32> to vector<8x6xf32>
    %51 = arith.mulf %50, %6 : vector<8x6xf32>
    %cst_28 = arith.constant 1.000000e+00 : f32
    %52 = vector.broadcast %cst_28 : f32 to vector<8x1xf32>
    %53 = arith.subf %52, %49 : vector<8x1xf32>
    %54 = vector.broadcast %53 : vector<8x1xf32> to vector<8x6xf32>
    %55 = arith.mulf %54, %39 : vector<8x6xf32>
    %56 = arith.addf %51, %55 : vector<8x6xf32>
    %c0_29 = arith.constant 0 : index
    %c0_30 = arith.constant 0 : index
    %57 = vector.load %arg13[%c0_29, %c0_30] : memref<8x1xf32, #tpu.memory_space<vmem>>, vector<8x1xf32>
    tpu.vector_store %arg13[%c0_29, %c0_30], %49 {strides = array<i32>} : memref<8x1xf32, #tpu.memory_space<vmem>>, vector<8x1xf32>,
    %c0_31 = arith.constant 0 : index
    %c0_32 = arith.constant 0 : index
    %58 = vector.load %arg12[%c0_31, %c0_32] : memref<8x6xf32, #tpu.memory_space<vmem>>, vector<8x6xf32>
    tpu.vector_store %arg12[%c0_31, %c0_32], %56 {strides = array<i32>} : memref<8x6xf32, #tpu.memory_space<vmem>>, vector<8x6xf32>,
    return
  }
  func.func @transform_0(%arg0: i32) -> (i32, i32) {
    %c0_i32 = arith.constant 0 : i32
    %c0_i32_0 = arith.constant 0 : i32
    return %arg0, %c0_i32 : i32, i32
  }
  func.func @transform_1(%arg0: i32) -> (i32, i32) {
    %c0_i32 = arith.constant 0 : i32
    %c0_i32_0 = arith.constant 0 : i32
    return %arg0, %c0_i32 : i32, i32
  }
  func.func @transform_2(%arg0: i32) -> (i32, i32) {
    %c0_i32 = arith.constant 0 : i32
    %c0_i32_0 = arith.constant 0 : i32
    %c0_i32_1 = arith.constant 0 : i32
    return %c0_i32, %c0_i32_0 : i32, i32
  }
  func.func @transform_3(%arg0: i32) -> (i32, i32) {
    %c0_i32 = arith.constant 0 : i32
    %c0_i32_0 = arith.constant 0 : i32
    %c0_i32_1 = arith.constant 0 : i32
    return %c0_i32, %c0_i32_0 : i32, i32
  }
  func.func @transform_4(%arg0: i32) -> (i32, i32) {
    %c0_i32 = arith.constant 0 : i32
    %c0_i32_0 = arith.constant 0 : i32
    %c0_i32_1 = arith.constant 0 : i32
    return %c0_i32, %c0_i32_0 : i32, i32
  }
  func.func @transform_5(%arg0: i32) -> (i32, i32) {
    %c0_i32 = arith.constant 0 : i32
    %c0_i32_0 = arith.constant 0 : i32
    %c0_i32_1 = arith.constant 0 : i32
    return %c0_i32, %c0_i32_0 : i32, i32
  }
  func.func @transform_6(%arg0: i32) -> (i32, i32) {
    %c0_i32 = arith.constant 0 : i32
    %c0_i32_0 = arith.constant 0 : i32
    %c0_i32_1 = arith.constant 0 : i32
    return %c0_i32, %c0_i32_0 : i32, i32
  }
  func.func @transform_7(%arg0: i32) -> (i32, i32) {
    %c0_i32 = arith.constant 0 : i32
    %c0_i32_0 = arith.constant 0 : i32
    %c0_i32_1 = arith.constant 0 : i32
    return %c0_i32, %c0_i32_0 : i32, i32
  }
  func.func @transform_8(%arg0: i32) -> (i32, i32) {
    %c0_i32 = arith.constant 0 : i32
    %c0_i32_0 = arith.constant 0 : i32
    %c0_i32_1 = arith.constant 0 : i32
    return %c0_i32, %c0_i32_0 : i32, i32
  }
  func.func @transform_9(%arg0: i32) -> (i32, i32) {
    %c0_i32 = arith.constant 0 : i32
    %c0_i32_0 = arith.constant 0 : i32
    %c0_i32_1 = arith.constant 0 : i32
    return %c0_i32, %c0_i32_0 : i32, i32
  }
  func.func @transform_10(%arg0: i32) -> (i32, i32) {
    %c0_i32 = arith.constant 0 : i32
    %c0_i32_0 = arith.constant 0 : i32
    %c0_i32_1 = arith.constant 0 : i32
    return %c0_i32, %c0_i32_0 : i32, i32
  }
  func.func @transform_11(%arg0: i32) -> (i32, i32) {
    %c0_i32 = arith.constant 0 : i32
    %c0_i32_0 = arith.constant 0 : i32
    return %arg0, %c0_i32 : i32, i32
  }
  func.func @transform_12(%arg0: i32) -> (i32, i32) {
    %c0_i32 = arith.constant 0 : i32
    %c0_i32_0 = arith.constant 0 : i32
    return %arg0, %c0_i32 : i32, i32
  }
}

</mosaic_0001>

<bundles_post_ra>
// kernel: tpu_custom_call.1
= control target key start
LH: loop header
LB: loop body
LE: loop exit
PB: predicated region body
PF: predicated region fallthrough
CT: control target
= control target key end

     0   :  { %s1000_s0 = inlined_call_operand.vmem [shape: f32[8,24], index: 0, kind: input, shape index: {}]   ;;  %s1001_s1 = inlined_call_operand.vmem [shape: s32[8,1], index: 1, kind: input, shape index: {}]   ;;  %s1002_s2 = inlined_call_operand.vmem [shape: bf16[24,128], index: 2, kind: input, shape index: {}]   ;;  %s1003_s3 = inlined_call_operand.vmem [shape: bf16[6,128], index: 3, kind: input, shape index: {}]   ;;  %s1004_s4 = inlined_call_operand.vmem [shape: f32[1,128], index: 4, kind: input, shape index: {}]   ;;  %s1005_s5 = inlined_call_operand.vmem [shape: bf16[128,128], index: 5, kind: input, shape index: {}]   ;;  %s1006_s6 = inlined_call_operand.vmem [shape: f32[1,128], index: 6, kind: input, shape index: {}]   ;;  %s1007_s7 = inlined_call_operand.vmem [shape: bf16[128,6], index: 7, kind: input, shape index: {}]   ;;  %s1008_s8 = inlined_call_operand.vmem [shape: f32[1,6], index: 8, kind: input, shape index: {}]   ;;  %s1009_s9 = inlined_call_operand.vmem [shape: bf16[128,1], index: 9, kind: input, shape index: {}]   ;;  %s1010_s10 = inlined_call_operand.<no memory space> [shape: f32[1,1], index: 10, kind: input, shape index: {}]   ;;  %s1011_s11 = inlined_call_operand.hbm [shape: f32[8,6], index: 11, kind: output, shape index: {0}]   ;;  %s1012_s12 = inlined_call_operand.vmem [shape: f32[8,1], index: 12, kind: output, shape index: {1}]  }
   0x1   :  { %v18_v0 = vstv %s1010_s10 }
   0x2   :  { %19 = vst [vmem:[#allocation2] sm:$0x1] %v18_v0 }
   0x3   :  { %v45_v1 = vld [vmem:[%s1001_s1] sm:$0xff]  ;;  %v770_v2 = vmov 0   ;;  %v771_v3 = vmov 0.0   ;;  %vm64_vm0 = vcmask 1042432   ;;  %vm772_vm1 = vmmov 0   ;;  %v711_v7 = vld [vmem:[%s1005_s5 + $0x8] sm:$0xff]  }
   0x4   :  { %706 = vset.pattern.permute.xlu0 %v770_v2  ;;  %628 = vmatprep.subr.bf16.mxu1 %v771_v3  ;;  %v59_v4 = vld [vmem:[%s1003_s3] sm:$0x7] }
   0x5   :  { %49 = vperm.xlu0 %706, %v45_v1   ;;  %v66_v5 = vsel %vm64_vm0, %v59_v4, 0  ;;  %642 = vmatprep.subr.bf16.mxu0 %v771_v3  ;;  %v710_v6 = vld [vmem:[%s1005_s5] sm:$0xff]  }
   0x6   :  { %629 = vmatpush3.bf16.msra.mxu1 %v66_v5  ;;  %707 = vset.pattern.permute.xlu1 %v770_v2 }
   0x7   :  { %634 = vmatprep.subr.bf16.mxu1 %v771_v3  ;;  %630 = vmatprep.mubr.msk.bf16.mxu1 %vm772_vm1, %v771_v3 }
   0x8   :  { %658 = vmatprep.mubr.msk.bf16.mxu0 %vm772_vm1, %v771_v3  ;;  %643 = vmatpush3.bf16.msra.mxu0 %v710_v6 }
   0x9   :  { %644 = vmatprep.subr.bf16.mxu0 %v771_v3 }
   0xc   :  { %645 = vmatpush3.bf16.msra.mxu0 %v711_v7 }
   0xd   :  { %646 = vmatprep.subr.bf16.mxu0 %v771_v3 }
   0xe   :  { %20 = vsyncpa [#allocation4], 0  ;;  %v46_v8 = vlaneseq  ;;  %vm60_vm3 = vcmask 48128   ;;  %v708_v12 = vld [vmem:[%s1002_s2] sm:$0xff]   ;;  %v709_v14 = vld [vmem:[%s1002_s2 + $0x8] ss:$0 sps:$4 sm:$0xff]  }
   0xf   :  { %vm121_vm4 = vcmask 1043456   ;;  %v44_v15 = vld [vmem:[%s1000_s0] sm:$0xff]  ;;  %vm117_vm5 = vcmask 195584   ;;  %v712_v18 = vld [vmem:[%s1005_s5 + $0x10] sm:$0xff]   ;;  %v713_v19 = vld [vmem:[%s1005_s5 + $0x18] sm:$0xff]   ;;  %vm541_vm6 = vcmask 7168  }
  0x10   :  { %v47_v9 = vand.u32 127, %v46_v8  ;;  %v123_v16 = vsel %vm121_vm4, %v709_v14, 0  ;;  %v55_v17 = vpack.c.bf16 %v44_v15, %v44_v15  ;;  %647 = vmatpush3.bf16.msra.mxu0 %v712_v18  ;;  %v714_v20 = vld [vmem:[%s1005_s5 + $0x20] sm:$0xff]   ;;  %v715_v21 = vld [vmem:[%s1005_s5 + $0x28] sm:$0xff]   ;;  %v716_v22 = vld [vmem:[%s1005_s5 + $0x30] sm:$0xff]  }
  0x11   :  { %648 = vmatprep.subr.bf16.mxu0 %v771_v3  ;;  %v717_v23 = vld [vmem:[%s1005_s5 + $0x38] sm:$0xff]   ;;  %v718_v24 = vld [vmem:[%s1007_s7] sm:$0xff]   ;;  %v720_v25 = vld [vmem:[%s1007_s7 + $0x8] sm:$0xff]  }
  0x12   :  { %v722_v26 = vld [vmem:[%s1007_s7 + $0x10] sm:$0xff]   ;;  %v724_v27 = vld [vmem:[%s1007_s7 + $0x18] sm:$0xff]   ;;  %v567_v33 = vld [vmem:[%s1004_s4] ss:$0 sm:$0xff] }
  0x13   :  { %v719_v40 = vld [vmem:[%s1009_s9] sm:$0xff]   ;;  %v721_v42 = vld [vmem:[%s1009_s9 + $0x8] sm:$0xff]   ;;  %v723_v43 = vld [vmem:[%s1009_s9 + $0x10] sm:$0xff]  }
  0x14   :  { %649 = vmatpush3.bf16.msra.mxu0 %v713_v19  ;;  %v725_v44 = vld [vmem:[%s1009_s9 + $0x18] sm:$0xff]   ;;  %v726_v45 = vld [vmem:[%s1007_s7 + $0x20] sm:$0xff]   ;;  %v728_v47 = vld [vmem:[%s1007_s7 + $0x28] sm:$0xff]  }
  0x15   :  { %650 = vmatprep.subr.bf16.mxu0 %v771_v3  ;;  %v727_v46 = vld [vmem:[%s1009_s9 + $0x20] sm:$0xff]   ;;  %v729_v48 = vld [vmem:[%s1009_s9 + $0x28] sm:$0xff]   ;;  %v730_v49 = vld [vmem:[%s1007_s7 + $0x30] sm:$0xff]  }
  0x16   :  { %v731_v50 = vld [vmem:[%s1009_s9 + $0x30] sm:$0xff]   ;;  %v732_v51 = vld [vmem:[%s1007_s7 + $0x38] sm:$0xff]   ;;  %v568_v53 = vld [vmem:[%s1006_s6] ss:$0 sm:$0xff] }
  0x17   :  { %v733_v52 = vld [vmem:[%s1009_s9 + $0x38] sm:$0xff]   ;;  %v577_v61 = vld [vmem:[%s1008_s8] ss:$0 sm:$0xff]  ;;  %s773_s9 = smov [#allocation3]  }
  0x18   :  { %651 = vmatpush3.bf16.msra.mxu0 %v714_v20  ;;  %v586_v62 = vld [vmem:[#allocation2] ss:$0 sm:$0xff]  ;;  %s550_s2 = sshll.u32 %s773_s9, 4  ;;  %s551_s2 = int_to_ptr.vmem [resolvable:$true] %s550_s2 }
  0x19   :  { %652 = vmatprep.subr.bf16.mxu0 %v771_v3  ;;  %p751_p1 = scmp.lt.s32.totalorder %s551_s2, %s551_s2 }
  0x1c   :  { %653 = vmatpush3.bf16.msra.mxu0 %v715_v21 }
  0x1d   :  { %654 = vmatprep.subr.bf16.mxu0 %v771_v3 }
  0x20   :  { %655 = vmatpush3.bf16.msra.mxu0 %v716_v22 }
  0x21   :  { %656 = vmatprep.subr.bf16.mxu0 %v771_v3 }
  0x24   :  { %657 = vmatpush3.bf16.msra.mxu0 %v717_v23 }
  0x25   :  { %682 = vmatprep.subr.bf16.mxu0 %v771_v3 }
  0x84   :  { %v50_v10 = vpop.permute.xlu0 %49 }
  0x85   :  { %vm51_vm2 = vcmp.eq.s32.totalorder %v47_v9, %v50_v10 }
  0x86   :  { %v864_v11 = vsel %vm51_vm2, 1.0, %v771_v3 }
  0x87   :  { %v54_v13 = vpack.c.bf16 %v864_v11, %v864_v11 }
  0x89   :  { %631 = vmatmul.mubr.msk.bf16.vlgmr.msra.gmra.mrb[0].mxu1 %vm60_vm3, %v54_v13 }
  0x8a   :  { %635 = vmatpush3.bf16.msra.mxu1 %v708_v12  ;;  %638 = vmatprep.mubr.msk.bf16.mxu1 %vm772_vm1, %v771_v3 }
  0x8b   :  { %636 = vmatprep.subr.bf16.mxu1 %v771_v3 }
  0x8e   :  { %637 = vmatpush3.bf16.msra.mxu1 %v123_v16 }
  0x8f   :  { %662 = vmatprep.subr.bf16.mxu1 %v771_v3 }
  0x91   :  { %639 = vmatmul.mubr.msk.bf16.vlgmr.msra.gmra.mrb[4].mxu1 %vm117_vm5, %v55_v17 }
  0x92   :  { %678 = vmatprep.mubr.msk.bf16.mxu1 %vm772_vm1, %v771_v3  ;;  %663 = vmatpush3.bf16.msra.mxu1 %v718_v24 }
  0x93   :  { %664 = vmatprep.subr.bf16.mxu1 %v771_v3 }
  0x96   :  { %665 = vmatpush3.bf16.msra.mxu1 %v720_v25 }
  0x97   :  { %666 = vmatprep.subr.bf16.mxu1 %v771_v3 }
  0x9a   :  { %667 = vmatpush3.bf16.msra.mxu1 %v722_v26 }
  0x9b   :  { %668 = vmatprep.subr.bf16.mxu1 %v771_v3 }
  0x9e   :  { %669 = vmatpush3.bf16.msra.mxu1 %v724_v27 }
  0x9f   :  { %670 = vmatprep.subr.bf16.mxu1 %v771_v3 }
  0xa2   :  { %671 = vmatpush3.bf16.msra.mxu1 %v726_v45 }
  0xa3   :  { %672 = vmatprep.subr.bf16.mxu1 %v771_v3 }
  0xa6   :  { %673 = vmatpush3.bf16.msra.mxu1 %v728_v47 }
  0xa7   :  { %674 = vmatprep.subr.bf16.mxu1 %v771_v3 }
  0xaa   :  { %675 = vmatpush3.bf16.msra.mxu1 %v730_v49 }
  0xab   :  { %676 = vmatprep.subr.bf16.mxu1 %v771_v3 }
  0xae   :  { %677 = vmatpush3.bf16.msra.mxu1 %v732_v51 }
 0x15c   :  { %v102_v28 = vpop.f32.mrb[0].mxu1 }
 0x15d   :  { %v632_v29 = vpop.f32.mrb[1].mxu1 }
 0x15e   :  { %v105_v30 = vpop.f32.mrb[2].mxu1 }
 0x15f   :  { %v633_v31 = vpop.f32.mrb[3].mxu1 }
 0x164   :  { %v159_v32 = vpop.f32.mrb[4].mxu1 }
 0x165   :  { %v160_v34 = vadd.f32 %v159_v32, %v102_v28  ;;  %v640_v35 = vpop.f32.mrb[5].mxu1 }
 0x166   :  { %v162_v36 = vpop.f32.mrb[6].mxu1 }
 0x167   :  { %v172_v37 = vadd.f32 %v567_v33, %v160_v34  ;;  %v641_v38 = vpop.f32.mrb[7].mxu1 }
 0x169   :  { %734 = vtanh.f32 %v172_v37 }
 0x173   :  { %v735_v39 = vpop.eup %734 }
 0x174   :  { %v174_v41 = vpack.c.bf16 %v735_v39, %v735_v39 }
 0x176   :  { %659 = vmatmul.mubr.bf16.vlgmr.msra.gmra.mrb[0].mxu0 %v174_v41 }
 0x177   :  { %683 = vmatpush3.bf16.msra.mxu0 %v719_v40  ;;  %698 = vmatprep.mubr.msk.bf16.mxu0 %vm772_vm1, %v771_v3 }
 0x178   :  { %684 = vmatprep.subr.bf16.mxu0 %v771_v3 }
 0x17b   :  { %685 = vmatpush3.bf16.msra.mxu0 %v721_v42 }
 0x17c   :  { %686 = vmatprep.subr.bf16.mxu0 %v771_v3 }
 0x17f   :  { %687 = vmatpush3.bf16.msra.mxu0 %v723_v43 }
 0x180   :  { %688 = vmatprep.subr.bf16.mxu0 %v771_v3 }
 0x183   :  { %689 = vmatpush3.bf16.msra.mxu0 %v725_v44 }
 0x184   :  { %690 = vmatprep.subr.bf16.mxu0 %v771_v3 }
 0x187   :  { %691 = vmatpush3.bf16.msra.mxu0 %v727_v46 }
 0x188   :  { %692 = vmatprep.subr.bf16.mxu0 %v771_v3 }
 0x18b   :  { %693 = vmatpush3.bf16.msra.mxu0 %v729_v48 }
 0x18c   :  { %694 = vmatprep.subr.bf16.mxu0 %v771_v3 }
 0x18f   :  { %695 = vmatpush3.bf16.msra.mxu0 %v731_v50 }
 0x190   :  { %696 = vmatprep.subr.bf16.mxu0 %v771_v3 }
 0x193   :  { %697 = vmatpush3.bf16.msra.mxu0 %v733_v52 }
 0x249   :  { %v280_v54 = vpop.f32.mrb[0].mxu0 }
 0x24a   :  { %v281_v55 = vadd.f32 %v568_v53, %v280_v54  ;;  %v660_v56 = vpop.f32.mrb[1].mxu0 }
 0x24b   :  { %v283_v57 = vpop.f32.mrb[2].mxu0 }
 0x24c   :  { %736 = vtanh.f32 %v281_v55  ;;  %v661_v58 = vpop.f32.mrb[3].mxu0 }
 0x256   :  { %v737_v59 = vpop.eup %736 }
 0x257   :  { %v287_v60 = vpack.c.bf16 %v737_v59, %v737_v59 }
 0x259   :  { %679 = vmatmul.mubr.bf16.vlgmr.msra.gmra.mrb[8].mxu1 %v287_v60  ;;  %699 = vmatmul.mubr.bf16.vlgmr.msra.gmra.mrb[4].mxu0 %v287_v60 }
 0x32c   :  { %v393_v63 = vpop.f32.mrb[8].mxu1  ;;  %v515_v0 = vpop.f32.mrb[4].mxu0 }
 0x32d   :  { %v394_v1 = vadd.f32 %v577_v61, %v393_v63  ;;  %v516_v2 = vadd.f32 %v586_v62, %v515_v0  ;;  %v680_v3 = vpop.f32.mrb[9].mxu1  ;;  %v700_v4 = vpop.f32.mrb[5].mxu0 }
 0x32e   :  { %v396_v5 = vpop.f32.mrb[10].mxu1  ;;  %v518_v6 = vpop.f32.mrb[6].mxu0 }
 0x32f   :  { %v595_v7 = vmul.f32 -1.442695, %v516_v2  ;;  %v681_v8 = vpop.f32.mrb[11].mxu1  ;;  %v701_v9 = vpop.f32.mrb[7].mxu0  ;;  %v399_v10 = vsel %vm60_vm3, %v394_v1, -inf }
 0x330   :  { %400 = vmax.xlane.f32.xlu0 %v399_v10 }
 0x331   :  { %738 = vpow2.f32 %v595_v7 }
 0x33b   :  { %v739_v12 = vpop.eup %738 }
 0x33c   :  { %v524_v13 = vadd.f32 1.0, %v739_v12 }
 0x33e   :  { %740 = vrcp.f32 %v524_v13 }
 0x348   :  { %v741_v14 = vpop.eup %740 }
 0x349   :  { %542 = vst.msk [vmem:[%s1012_s12] sm:$0xff] %vm541_vm6, %v741_v14  ;;  %529 = vperm.xlu1 %707, %v741_v14   ;;  %v533_v20 = vsub.f32 1.0, %v741_v14  ;;  %s746_s12 = scalar_lea.vmem %s551_s2, 128 }
 0x34a   :  { %p747_p0 = scmp.ne.s32.totalorder %s551_s2, %s746_s12  ;;  %p752_p2 = scmp.lt.s32.totalorder %s746_s12, %s746_s12 }
 0x34c   :  { %p753_p3 = por %p752_p2, %p751_p1 }
 0x34e   :  { %p754_p4 = pnand %p753_p3, %p747_p0 }
 0x3bd   :  { %v401_v15 = vpop.xlane.xlu0 %400 }
 0x3be   :  { %v402_v16 = vsub.f32 %v394_v1, %v401_v15 }
 0x3c0   :  { %v403_v17 = vmul.f32 1.442695, %v402_v16 }
 0x3c2   :  { %742 = vpow2.f32 %v403_v17 }
 0x3c8   :  { %v530_v21 = vpop.permute.xlu1 %529 }
 0x3c9   :  { %v532_v26 = vmul.f32 %v864_v11, %v530_v21 }
 0x3cc   :  { %v743_v18 = vpop.eup %742 }
 0x3cd   :  { %v405_v19 = vsel %vm60_vm3, %v743_v18, 0.0 }
 0x3ce   :  { %406 = vadd.xlane.f32.xlu1 %v405_v19 }
 0x3df   :  { %536 = vperm.xlu1 %707, %v533_v20  }
 0x45b   :  { %v407_v22 = vpop.xlane.xlu1 %406 }
 0x45c   :  { %744 = vrcp.f32 %v407_v22 }
 0x45f   :  { %v537_v25 = vpop.permute.xlu1 %536 }
 0x466   :  { %v745_v23 = vpop.eup %744 }
 0x467   :  { %v409_v24 = vmul.f32 %v745_v23, %v743_v18 }
 0x469   :  { %v539_v27 = vmul.f32 %v537_v25, %v409_v24 }
 0x46b   :  { %v540_v28 = vadd.f32 %v539_v27, %v532_v26 }
 0x46d   :  { %543 = vst.msk [vmem:[#allocation3] sm:$0xff] %vm60_vm3, %v540_v28 }
 0x46e   :  { %757 = shalt.err (!%p754_p4)
}
 0x46f   :  { %s758_s17 = scalar_lea.hbm %s1011_s11, 128 }
 0x470   :  { %p759_p5 = scmp.ne.s32.totalorder %s1011_s11, %s758_s17  ;;  %p762_p6 = scmp.lt.u32.totalorder %s758_s17, %s1011_s11 }
 0x472   :  { %p764_p7 = pnand %p762_p6, %p759_p5 }
 0x474   :  { %767 = shalt.err (!%p764_p7)
}
 0x475   :  { %553 = dma.vmem_to_hbm [thread:$0]  %s551_s2, 128, %s1011_s11, [#allocation4]  }
 0x476   :  { %768 = dma.done.wait [#allocation4], 128  }
 0x477   :  { %769 = vsyncadd [#allocation4], 4294967168 }
 0x478   :  { %561 = vsyncpa [#allocation4], 1 }

</bundles_post_ra>
